<compile_context>
chip_gen: v6e
topology: v6e:2x2x1
jax: 0.10.0
libtpu: 0.0.40
codegen_flags: <defaults>
</compile_context>

<pallas_src>
import math

import jax
import jax.numpy as jnp
from jax.experimental import pallas as pl
from jax.experimental.pallas import tpu as pltpu


# ---------------------------------------------------------------------------
# Pass 2 kernels: lane-dense elementwise scaling (the bandwidth-bound part).
# ---------------------------------------------------------------------------
def _scale_kernel_k1(x_ref, x1_ref, g_ref, v1_ref, v2_ref):
    # x_ref/x1_ref: (row_blk, lane_blk) tiles; g_ref: (2, row_blk, 1) per-row
    # gates (one gate per (batch, channel) row, broadcast across the lanes).
    g0 = g_ref[0]                                   # (row_blk, 1) f32
    g1 = g_ref[1]
    # Multiply in f32, cast only at the final store (no-op for f32 inputs;
    # correct path for bf16 inputs on v5e which has no bf16 VALU).
    v1_ref[...] = (x_ref[...].astype(jnp.float32) * g0).astype(v1_ref.dtype)
    v2_ref[...] = (x1_ref[...].astype(jnp.float32) * g1).astype(v2_ref.dtype)


def _scale_kernel_folded(x_ref, x1_ref, g_ref, e_ref, v1_ref, v2_ref):
    # x_ref/x1_ref: (row_blk, lane_blk) lane-dense folded tiles.
    # g_ref: (2, row_blk, k) per-segment gates.
    # e_ref: (k, lane_blk) static 0/1 expansion matrix (e[i, l] = 1 iff lane l
    #        belongs to segment i).  The tiny MXU matmul expands the gates to
    #        per-lane values without any in-kernel reshape/relayout.
    e = e_ref[...]
    g0 = jnp.dot(g_ref[0], e, preferred_element_type=jnp.float32)  # (row_blk, lane_blk)
    g1 = jnp.dot(g_ref[1], e, preferred_element_type=jnp.float32)
    v1_ref[...] = (x_ref[...].astype(jnp.float32) * g0).astype(v1_ref.dtype)
    v2_ref[...] = (x1_ref[...].astype(jnp.float32) * g1).astype(v2_ref.dtype)


# ---------------------------------------------------------------------------
# Chip-aware VMEM budget and tiling.
# ---------------------------------------------------------------------------
def _vmem_budget():
    """Returns (vmem_limit_bytes, per-tensor tile_bytes) derived from the chip."""
    try:
        cap = int(pltpu.get_tpu_info().vmem_capacity_bytes)
    except Exception:
        cap = 64 * 1024 * 1024          # conservative (v7x-sized) fallback
    vmem_limit = (cap * 3) // 4         # ~96 MiB on v5e/v6e, ~48 MiB on v7x
    # 4 streamed tensors x 2 pipeline buffers; keep ~20% headroom for the gate
    # / expansion-matrix operands and Mosaic internal scratch.
    tile_bytes = min(8 * 1024 * 1024, (vmem_limit * 4) // (5 * 8))
    return vmem_limit, tile_bytes


def _elementwise_blocks(rows_f, lane_extent, itemsize, tile_bytes):
    # Lane axis first: as wide as fits the per-tensor budget.  Using the full
    # extent needs no 128 alignment; a partial block is kept a multiple of 128.
    max_lanes = max(128, tile_bytes // (8 * itemsize))
    if lane_extent <= max_lanes:
        lane_blk = lane_extent
    else:
        lane_blk = (max_lanes // 128) * 128
    # Sublane (row) axis: fill the rest of the per-tensor tile budget.
    max_rows = max(8, (tile_bytes // (lane_blk * itemsize)) // 8 * 8)
    # Keep >= 2 row-blocks on non-trivial inputs so v7x's two TensorCores both
    # get grid blocks (tiles stay multi-MiB, so no cost on v5e/v6e).
    if rows_f >= 16 and rows_f * lane_extent * itemsize >= (1 << 20):
        half = ((-(-rows_f // 2)) + 7) // 8 * 8     # ceil(rows_f/2) rounded to 8
        max_rows = min(max_rows, max(8, half))
    row_blk = min(rows_f, max_rows)
    if row_blk < rows_f:
        row_blk = max(8, (row_blk // 8) * 8)
    return row_blk, lane_blk


# ---------------------------------------------------------------------------
# Pass 1: per-(batch, channel) gates — tiny, batched across B, plain XLA.
# ---------------------------------------------------------------------------
def _sk_gates(x_nchw, x1_nchw, params):
    # Channel descriptor: spatial mean of U = x + x1, accumulated in f32.
    # (add + cast + reduction fuse into one streaming HBM pass under XLA.)
    s = jnp.mean((x_nchw + x1_nchw).astype(jnp.float32), axis=(2, 3))   # (B, C)
    z = s @ params["wfc"].astype(jnp.float32).T + params["bfc"]         # (B, d)
    l0 = z @ params["w0"].astype(jnp.float32).T + params["b0"]          # (B, C)
    l1 = z @ params["w1"].astype(jnp.float32).T + params["b1"]          # (B, C)
    # Softmax over the two branches (dim=0 of the PyTorch stack).
    m = jnp.maximum(l0, l1)
    e0 = jnp.exp(l0 - m)
    e1 = jnp.exp(l1 - m)
    inv = 1.0 / (e0 + e1)
    # Fold the residual add into the gate: v_i = x_i + a_i*x_i = (1 + a_i)*x_i.
    return 1.0 + e0 * inv, 1.0 + e1 * inv                               # (B, C) f32


# ---------------------------------------------------------------------------
# Full forward.
# ---------------------------------------------------------------------------
def sk_attention_pallas(x_nchw, x1_nchw, params):
    bs, c, h, w = x_nchw.shape
    hw = h * w
    rows = bs * c
    dtype = x_nchw.dtype
    itemsize = jnp.dtype(dtype).itemsize

    # ---- Pass 1: gates (B, C), f32, tiny. ----
    g0, g1 = _sk_gates(x_nchw, x1_nchw, params)
    gates = jnp.stack([g0.reshape(rows), g1.reshape(rows)], axis=0)      # (2, rows)

    # ---- Lane-density folding: view (rows, hw) as (rows/k, k*hw). ----
    k = 128 // math.gcd(hw, 128)
    if k > 1 and rows % k != 0:
        k = 1                                   # not foldable: fall back
    rows_f = rows // k
    lane_extent = k * hw                        # multiple of 128 whenever k > 1

    # NCHW is contiguous: these are free reshapes — no layout transposes.
    x2 = x_nchw.reshape(rows_f, lane_extent)
    x12 = x1_nchw.reshape(rows_f, lane_extent)
    gates = gates.reshape(2, rows_f, k)

    vmem_limit, tile_bytes = _vmem_budget()
    row_blk, lane_blk = _elementwise_blocks(rows_f, lane_extent, itemsize, tile_bytes)
    grid = (pl.cdiv(rows_f, row_blk), pl.cdiv(lane_extent, lane_blk))

    data_spec = pl.BlockSpec((row_blk, lane_blk), lambda i, j: (i, j))
    gate_spec = pl.BlockSpec((2, row_blk, k), lambda i, j: (0, i, 0))

    operands = [x2, x12, gates]
    in_specs = [data_spec, data_spec, gate_spec]
    if k == 1:
        kernel = _scale_kernel_k1
    else:
        kernel = _scale_kernel_folded
        # Static 0/1 expansion matrix: lane l belongs to segment l // hw.
        seg = jnp.arange(lane_extent, dtype=jnp.int32) // hw
        e = (seg[None, :] == jnp.arange(k, dtype=jnp.int32)[:, None]).astype(jnp.float32)
        operands.append(e)
        in_specs.append(pl.BlockSpec((k, lane_blk), lambda i, j: (0, j)))

    bytes_accessed = 4 * rows * hw * itemsize + 2 * rows * 4
    flops = 2 * rows * hw
    if k > 1:
        bytes_accessed += k * lane_extent * 4
        flops += 2 * 2 * rows_f * k * lane_extent   # gate-expansion matmuls

    v1, v2 = pl.pallas_call(
        kernel,
        out_shape=(jax.ShapeDtypeStruct((rows_f, lane_extent), dtype),
                   jax.ShapeDtypeStruct((rows_f, lane_extent), dtype)),
        grid=grid,
        in_specs=in_specs,
        out_specs=(data_spec, data_spec),
        compiler_params=pltpu.CompilerParams(
            dimension_semantics=("parallel", "parallel"),
            vmem_limit_bytes=int(vmem_limit)),
        cost_estimate=pl.CostEstimate(
            flops=int(flops),
            transcendentals=0,
            bytes_accessed=int(bytes_accessed)),
    )(*operands)

    return v1.reshape(bs, c, h, w), v2.reshape(bs, c, h, w)


# ---------------------------------------------------------------------------
# Pure-JAX reference mirroring the PyTorch forward (NCHW).
# ---------------------------------------------------------------------------
def sk_attention_reference(x, x1, params):
    u = x + x1
    s = u.mean(axis=(2, 3))                                  # (B, C)
    z = s @ params["wfc"].T + params["bfc"]                  # (B, d)
    l0 = z @ params["w0"].T + params["b0"]                   # (B, C)
    l1 = z @ params["w1"].T + params["b1"]                   # (B, C)
    a = jax.nn.softmax(jnp.stack([l0, l1], axis=0), axis=0)  # (2, B, C)
    v1 = x + a[0][:, :, None, None] * x
    v2 = x1 + a[1][:, :, None, None] * x1
    return v1, v2


def make_params(key, channel, reduction=16, L=32):
    d = max(L, channel // reduction)
    k1, k2, k3, k4, k5, k6 = jax.random.split(key, 6)
    # Deterministic synthetic init (not a checkpoint load).
    return {
        "wfc": jax.random.normal(k1, (d, channel), jnp.float32) * 0.05,
        "bfc": jax.random.normal(k2, (d,), jnp.float32) * 0.05,
        "w0": jax.random.normal(k3, (channel, d), jnp.float32) * 0.05,
        "b0": jax.random.normal(k4, (channel,), jnp.float32) * 0.05,
        "w1": jax.random.normal(k5, (channel, d), jnp.float32) * 0.05,
        "b1": jax.random.normal(k6, (channel,), jnp.float32) * 0.05,
    }


if __name__ == "__main__":
    # Small shapes consistent with the module: B=2, C=64, H=W=8 (d = max(32, 4) = 32).
    # hw = 64 exercises the lane-folding path (k = 2).
    bs, c, h, w = 2, 64, 8, 8
    key = jax.random.PRNGKey(0)
    kx, kx1, kp = jax.random.split(key, 3)
    x = jax.random.normal(kx, (bs, c, h, w), jnp.float32)
    x1 = jax.random.normal(kx1, (bs, c, h, w), jnp.float32)
    params = make_params(kp, channel=c, reduction=16, L=32)

    fwd = jax.jit(sk_attention_pallas)
    v1, v2 = fwd(x, x1, params)
    jax.block_until_ready((v1, v2))

    r1, r2 = sk_attention_reference(x, x1, params)
    assert jnp.allclose(v1, r1, atol=1e-5, rtol=1e-5), "v1 mismatch vs reference"
    assert jnp.allclose(v2, r2, atol=1e-5, rtol=1e-5), "v2 mismatch vs reference"

    print("KERNEL_OK")
</pallas_src>

<mosaic_0001>
module attributes {stable_mosaic.version = 11 : i64} {
  func.func @_scale_kernel_folded(%arg0: i32, %arg1: i32, %arg2: memref<64x128xf32, #tpu.memory_space<vmem>>, %arg3: memref<64x128xf32, #tpu.memory_space<vmem>>, %arg4: memref<2x64x2xf32, #tpu.memory_space<vmem>>, %arg5: memref<2x128xf32, #tpu.memory_space<vmem>>, %arg6: memref<64x128xf32, #tpu.memory_space<vmem>>, %arg7: memref<64x128xf32, #tpu.memory_space<vmem>>) attributes {dimension_semantics = [#tpu.dimension_semantics<parallel>, #tpu.dimension_semantics<parallel>], iteration_bounds = array<i64: 1, 1>, scalar_prefetch = 0 : i64, scratch_operands = 0 : i64, tpu.core_type = #tpu.core_type<tc>, window_params = [{transform_indices = @transform_0, window_bounds = array<i64: 64, 128>}, {transform_indices = @transform_1, window_bounds = array<i64: 64, 128>}, {transform_indices = @transform_2, window_bounds = array<i64: 2, 64, 2>}, {transform_indices = @transform_3, window_bounds = array<i64: 2, 128>}, {transform_indices = @transform_4, window_bounds = array<i64: 64, 128>}, {transform_indices = @transform_5, window_bounds = array<i64: 64, 128>}]} {
    %c0 = arith.constant 0 : index
    %c0_0 = arith.constant 0 : index
    %0 = vector.load %arg5[%c0, %c0_0] : memref<2x128xf32, #tpu.memory_space<vmem>>, vector<2x128xf32>
    %c0_1 = arith.constant 0 : index
    %c0_2 = arith.constant 0 : index
    %c0_3 = arith.constant 0 : index
    %1 = vector.load %arg4[%c0_1, %c0_2, %c0_3] : memref<2x64x2xf32, #tpu.memory_space<vmem>>, vector<1x64x2xf32>
    %2 = vector.shape_cast %1 : vector<1x64x2xf32> to vector<64x2xf32>
    %cst = arith.constant dense<0.000000e+00> : vector<64x128xf32>
    %3 = tpu.matmul %2, %0, %cst {dimension_numbers = #tpu.dot_dimension_numbers<[1], [0], [0], [1], [0, 0, 1, 1], [], []>} : vector<64x2xf32>, vector<2x128xf32>, vector<64x128xf32> -> vector<64x128xf32>
    %c1 = arith.constant 1 : index
    %c0_4 = arith.constant 0 : index
    %c0_5 = arith.constant 0 : index
    %4 = vector.load %arg4[%c1, %c0_4, %c0_5] : memref<2x64x2xf32, #tpu.memory_space<vmem>>, vector<1x64x2xf32>
    %5 = vector.shape_cast %4 : vector<1x64x2xf32> to vector<64x2xf32>
    %cst_6 = arith.constant dense<0.000000e+00> : vector<64x128xf32>
    %6 = tpu.matmul %5, %0, %cst_6 {dimension_numbers = #tpu.dot_dimension_numbers<[1], [0], [0], [1], [0, 0, 1, 1], [], []>} : vector<64x2xf32>, vector<2x128xf32>, vector<64x128xf32> -> vector<64x128xf32>
    %c0_7 = arith.constant 0 : index
    %c0_8 = arith.constant 0 : index
    %7 = vector.load %arg2[%c0_7, %c0_8] : memref<64x128xf32, #tpu.memory_space<vmem>>, vector<64x128xf32>
    %8 = arith.mulf %7, %3 : vector<64x128xf32>
    %c0_9 = arith.constant 0 : index
    %c0_10 = arith.constant 0 : index
    %9 = vector.load %arg6[%c0_9, %c0_10] : memref<64x128xf32, #tpu.memory_space<vmem>>, vector<64x128xf32>
    tpu.vector_store %arg6[%c0_9, %c0_10], %8 {strides = array<i32>} : memref<64x128xf32, #tpu.memory_space<vmem>>, vector<64x128xf32>,
    %c0_11 = arith.constant 0 : index
    %c0_12 = arith.constant 0 : index
    %10 = vector.load %arg3[%c0_11, %c0_12] : memref<64x128xf32, #tpu.memory_space<vmem>>, vector<64x128xf32>
    %11 = arith.mulf %10, %6 : vector<64x128xf32>
    %c0_13 = arith.constant 0 : index
    %c0_14 = arith.constant 0 : index
    %12 = vector.load %arg7[%c0_13, %c0_14] : memref<64x128xf32, #tpu.memory_space<vmem>>, vector<64x128xf32>
    tpu.vector_store %arg7[%c0_13, %c0_14], %11 {strides = array<i32>} : memref<64x128xf32, #tpu.memory_space<vmem>>, vector<64x128xf32>,
    return
  }
  func.func @transform_0(%arg0: i32, %arg1: i32) -> (i32, i32) {
    %c0_i32 = arith.constant 0 : i32
    return %arg0, %arg1 : i32, i32
  }
  func.func @transform_1(%arg0: i32, %arg1: i32) -> (i32, i32) {
    %c0_i32 = arith.constant 0 : i32
    return %arg0, %arg1 : i32, i32
  }
  func.func @transform_2(%arg0: i32, %arg1: i32) -> (i32, i32, i32) {
    %c0_i32 = arith.constant 0 : i32
    %c0_i32_0 = arith.constant 0 : i32
    %c0_i32_1 = arith.constant 0 : i32
    return %c0_i32, %arg0, %c0_i32_0 : i32, i32, i32
  }
  func.func @transform_3(%arg0: i32, %arg1: i32) -> (i32, i32) {
    %c0_i32 = arith.constant 0 : i32
    %c0_i32_0 = arith.constant 0 : i32
    return %c0_i32, %arg1 : i32, i32
  }
  func.func @transform_4(%arg0: i32, %arg1: i32) -> (i32, i32) {
    %c0_i32 = arith.constant 0 : i32
    return %arg0, %arg1 : i32, i32
  }
  func.func @transform_5(%arg0: i32, %arg1: i32) -> (i32, i32) {
    %c0_i32 = arith.constant 0 : i32
    return %arg0, %arg1 : i32, i32
  }
}

</mosaic_0001>

<bundles_post_ra>
// kernel: sk_attention_pallas.1
= control target key start
LH: loop header
LB: loop body
LE: loop exit
PB: predicated region body
PF: predicated region fallthrough
CT: control target
= control target key end

     0   :  { %vm53_vm0 = vcmask 1041408   ;;  %vm28_vm1 = vcmask 15360   ;;  %s621_s3 = inlined_call_operand.vmem [shape: f32[2,128], index: 3, kind: input, shape index: {}]   ;;  %s622_s2 = inlined_call_operand.vmem [shape: f32[2,64,2], index: 2, kind: input, shape index: {}]   ;;  %s623_s0 = inlined_call_operand.vmem [shape: f32[64,128], index: 0, kind: input, shape index: {}]   ;;  %s624_s1 = inlined_call_operand.vmem [shape: f32[64,128], index: 1, kind: input, shape index: {}]   ;;  %s625_s4 = inlined_call_operand.vmem [shape: f32[64,128], index: 4, kind: output, shape index: {0}]   ;;  %s626_s5 = inlined_call_operand.vmem [shape: f32[64,128], index: 5, kind: output, shape index: {1}]  }
   0x1   :  { %v19_v0 = vld [vmem:[%s621_s3] sm:$0x3]  ;;  %v21_v3 = vld [vmem:[%s622_s2 + $0x8] sm:$0xff]  ;;  %v22_v5 = vld [vmem:[%s622_s2 + $0x10] sm:$0xff] }
   0x2   :  { %v20_v1 = vld [vmem:[%s622_s2] sm:$0xff]  ;;  %400 = vmatprep.subr.msk.mxu0 %vm53_vm0, %v19_v0  ;;  %414 = vmatprep.subr.msk.mxu1 %vm53_vm0, %v19_v0  ;;  %v366_v4 = vld [vmem:[%s622_s2 + $0x48] sm:$0xff]  ;;  %v367_v6 = vld [vmem:[%s622_s2 + $0x50] sm:$0xff] }
   0x3   :  { %v365_v2 = vld [vmem:[%s622_s2 + $0x40] sm:$0xff]  ;;  %401 = vmatpush3.msk.msra.mxu0 %vm53_vm0, %v19_v0  ;;  %402 = vmatprep.mubr.msk.f32.mxu0 %vm28_vm1, %v20_v1  ;;  %v23_v7 = vld [vmem:[%s622_s2 + $0x18] sm:$0xff]  ;;  %v25_v11 = vld [vmem:[%s622_s2 + $0x28] sm:$0xff] }
   0x4   :  { %415 = vmatpush3.msk.msra.mxu1 %vm53_vm0, %v19_v0  ;;  %416 = vmatprep.mubr.msk.f32.mxu1 %vm28_vm1, %v365_v2  ;;  %v368_v8 = vld [vmem:[%s622_s2 + $0x58] sm:$0xff]  ;;  %v24_v9 = vld [vmem:[%s622_s2 + $0x20] sm:$0xff]  ;;  %v370_v12 = vld [vmem:[%s622_s2 + $0x68] sm:$0xff] }
   0x5   :  { %403 = vmatmul.mubr.msk.f32.vlgmr.msra.gmra.mxu0 %vm28_vm1, %v21_v3  ;;  %417 = vmatmul.mubr.msk.f32.vlgmr.msra.gmra.mxu1 %vm28_vm1, %v366_v4  ;;  %v369_v10 = vld [vmem:[%s622_s2 + $0x60] sm:$0xff]  ;;  %v26_v13 = vld [vmem:[%s622_s2 + $0x30] sm:$0xff]  ;;  %v27_v15 = vld [vmem:[%s622_s2 + $0x38] sm:$0xff] }
   0x6   :  { %405 = vmatprep.mubr.msk.f32.mxu0 %vm28_vm1, %v22_v5  ;;  %419 = vmatprep.mubr.msk.f32.mxu1 %vm28_vm1, %v367_v6  ;;  %v371_v14 = vld [vmem:[%s622_s2 + $0x70] sm:$0xff]  ;;  %v372_v16 = vld [vmem:[%s622_s2 + $0x78] sm:$0xff]  ;;  %v301_v17 = vld [vmem:[%s623_s0 + $0x8] sm:$0xff] }
   0x7   :  { %v325_v18 = vld [vmem:[%s624_s1 + $0x8] sm:$0xff]  ;;  %v300_v21 = vld [vmem:[%s623_s0] sm:$0xff]  ;;  %v303_v27 = vld [vmem:[%s623_s0 + $0x18] sm:$0xff] }
   0x8   :  { %v324_v22 = vld [vmem:[%s624_s1] sm:$0xff]  ;;  %v327_v28 = vld [vmem:[%s624_s1 + $0x18] sm:$0xff]  ;;  %v302_v33 = vld [vmem:[%s623_s0 + $0x10] sm:$0xff] }
   0x9   :  { %406 = vmatmul.mubr.msk.f32.gmra.mxu0 %vm28_vm1, %v23_v7  ;;  %420 = vmatmul.mubr.msk.f32.gmra.mxu1 %vm28_vm1, %v368_v8  ;;  %v326_v34 = vld [vmem:[%s624_s1 + $0x10] sm:$0xff]  ;;  %v305_v39 = vld [vmem:[%s623_s0 + $0x28] sm:$0xff]  ;;  %v304_v45 = vld [vmem:[%s623_s0 + $0x20] sm:$0xff] }
   0xa   :  { %408 = vmatprep.mubr.msk.f32.mxu0 %vm28_vm1, %v24_v9  ;;  %422 = vmatprep.mubr.msk.f32.mxu1 %vm28_vm1, %v369_v10  ;;  %v329_v40 = vld [vmem:[%s624_s1 + $0x28] sm:$0xff]  ;;  %v328_v46 = vld [vmem:[%s624_s1 + $0x20] sm:$0xff]  ;;  %v307_v51 = vld [vmem:[%s623_s0 + $0x38] sm:$0xff] }
   0xb   :  { %v331_v52 = vld [vmem:[%s624_s1 + $0x38] sm:$0xff]  ;;  %v306_v57 = vld [vmem:[%s623_s0 + $0x30] sm:$0xff] }
   0xc   :  { %v330_v58 = vld [vmem:[%s624_s1 + $0x30] sm:$0xff] }
   0xd   :  { %409 = vmatmul.mubr.msk.f32.gmra.mxu0 %vm28_vm1, %v25_v11  ;;  %423 = vmatmul.mubr.msk.f32.gmra.mxu1 %vm28_vm1, %v370_v12 }
   0xe   :  { %411 = vmatprep.mubr.msk.f32.mxu0 %vm28_vm1, %v26_v13  ;;  %425 = vmatprep.mubr.msk.f32.mxu1 %vm28_vm1, %v371_v14 }
  0x11   :  { %412 = vmatmul.mubr.msk.f32.gmra.mxu0 %vm28_vm1, %v27_v15  ;;  %426 = vmatmul.mubr.msk.f32.gmra.mxu1 %vm28_vm1, %v372_v16 }
  0xc5   :  { %v404_v19 = vpop.f32.mrf.mxu0  ;;  %v418_v20 = vpop.f32.mrf.mxu1 }
  0xc6   :  { %v309_v23 = vmul.f32 %v404_v19, %v301_v17  ;;  %v333_v24 = vmul.f32 %v418_v20, %v325_v18 }
  0xc7   :  { %v123_v25 = vpop.f32.mrf.mxu0  ;;  %v261_v26 = vpop.f32.mrf.mxu1 }
  0xc8   :  { %317 = vst [vmem:[%s625_s4 + $0x8] sm:$0xff] %v309_v23  ;;  %341 = vst [vmem:[%s626_s5 + $0x8] sm:$0xff] %v333_v24  ;;  %v308_v29 = vmul.f32 %v300_v21, %v123_v25  ;;  %v332_v30 = vmul.f32 %v324_v22, %v261_v26 }
  0xc9   :  { %v407_v31 = vpop.f32.mrf.mxu0  ;;  %v421_v32 = vpop.f32.mrf.mxu1 }
  0xca   :  { %316 = vst [vmem:[%s625_s4] sm:$0xff] %v308_v29  ;;  %340 = vst [vmem:[%s626_s5] sm:$0xff] %v332_v30  ;;  %v311_v35 = vmul.f32 %v407_v31, %v303_v27  ;;  %v335_v36 = vmul.f32 %v421_v32, %v327_v28 }
  0xcb   :  { %v133_v37 = vpop.f32.mrf.mxu0  ;;  %v271_v38 = vpop.f32.mrf.mxu1 }
  0xcc   :  { %319 = vst [vmem:[%s625_s4 + $0x18] sm:$0xff] %v311_v35  ;;  %343 = vst [vmem:[%s626_s5 + $0x18] sm:$0xff] %v335_v36  ;;  %v310_v41 = vmul.f32 %v302_v33, %v133_v37  ;;  %v334_v42 = vmul.f32 %v326_v34, %v271_v38 }
  0xcd   :  { %v410_v43 = vpop.f32.mrf.mxu0  ;;  %v424_v44 = vpop.f32.mrf.mxu1 }
  0xce   :  { %318 = vst [vmem:[%s625_s4 + $0x10] sm:$0xff] %v310_v41  ;;  %342 = vst [vmem:[%s626_s5 + $0x10] sm:$0xff] %v334_v42  ;;  %v313_v47 = vmul.f32 %v410_v43, %v305_v39  ;;  %v337_v48 = vmul.f32 %v424_v44, %v329_v40 }
  0xcf   :  { %v143_v49 = vpop.f32.mrf.mxu0  ;;  %v281_v50 = vpop.f32.mrf.mxu1 }
  0xd0   :  { %321 = vst [vmem:[%s625_s4 + $0x28] sm:$0xff] %v313_v47  ;;  %345 = vst [vmem:[%s626_s5 + $0x28] sm:$0xff] %v337_v48  ;;  %v312_v53 = vmul.f32 %v304_v45, %v143_v49  ;;  %v336_v54 = vmul.f32 %v328_v46, %v281_v50 }
  0xd1   :  { %v413_v55 = vpop.f32.mrf.mxu0  ;;  %v427_v56 = vpop.f32.mrf.mxu1 }
  0xd2   :  { %320 = vst [vmem:[%s625_s4 + $0x20] sm:$0xff] %v312_v53  ;;  %344 = vst [vmem:[%s626_s5 + $0x20] sm:$0xff] %v336_v54  ;;  %v315_v59 = vmul.f32 %v413_v55, %v307_v51  ;;  %v339_v60 = vmul.f32 %v427_v56, %v331_v52 }
  0xd3   :  { %v153_v61 = vpop.f32.mrf.mxu0  ;;  %v291_v62 = vpop.f32.mrf.mxu1 }
  0xd4   :  { %323 = vst [vmem:[%s625_s4 + $0x38] sm:$0xff] %v315_v59  ;;  %347 = vst [vmem:[%s626_s5 + $0x38] sm:$0xff] %v339_v60  ;;  %v314_v63 = vmul.f32 %v306_v57, %v153_v61  ;;  %v338_v0 = vmul.f32 %v330_v58, %v291_v62 }
  0xd6   :  { %322 = vst [vmem:[%s625_s4 + $0x30] sm:$0xff] %v314_v63  ;;  %346 = vst [vmem:[%s626_s5 + $0x30] sm:$0xff] %v338_v0 }

</bundles_post_ra>
